<compile_context>
chip_gen: v6e
topology: v6e:2x2x1
jax: 0.10.0
libtpu: 0.0.40
codegen_flags: <defaults>
</compile_context>

<pallas_src>
import jax
import jax.numpy as jnp
from jax.experimental import pallas as pl
from jax.experimental.pallas import tpu as pltpu


def _add_inverse_kernel_4d(x_ref, o_ref):
    # x_ref block: (B, R, L); o_ref block: (B, 2, R, L)
    x = x_ref[...]
    o_ref[:, 0, :, :] = x
    o_ref[:, 1, :, :] = 1 - x  # weak-typed 1: preserves input dtype


def _add_inverse_kernel_3d(x_ref, o_ref):
    # x_ref block: (B, L); o_ref block: (B, 2, L)
    x = x_ref[...]
    o_ref[:, 0, :] = x
    o_ref[:, 1, :] = 1 - x


def _round_up(a, b):
    return -(-a // b) * b


def _vmem_budget(itemsize):
    """Generation-aware block sizing (v5e/v6e: 128 MiB VMEM, v7x: 64 MiB)."""
    try:
        vmem_cap = int(pltpu.get_tpu_info().vmem_capacity_bytes)
    except Exception:
        vmem_cap = 64 * 1024 * 1024  # be conservative: assume v7x-sized VMEM
    # Scoped limit: half of physical, capped at 64 MiB (64 MiB v5e/v6e, 32 MiB v7x).
    vmem_limit = min(vmem_cap // 2, 64 * 1024 * 1024)
    # Input-block target.  Footprint per step is ~3x the input block
    # (1x in + 2x out), double-buffered -> 6x; /8 leaves headroom.
    # => ~8 MiB input blocks on v5e/v6e, ~4 MiB on v7x.
    tgt_elems = max(1, (vmem_limit // 8) // itemsize)
    return vmem_limit, tgt_elems


def add_inverse(x):
    """Equivalent of AddInverse(dim=1): concat([x, 1 - x], axis=1) for NCHW input."""
    n, c, h, w = x.shape
    chw = c * h * w
    itemsize = jnp.dtype(x.dtype).itemsize
    vmem_limit, tgt_elems = _vmem_budget(itemsize)
    # Sublane granularity: 8 for 32-bit, 16 for bf16, 32 for int8/fp8.
    sub = max(8, 32 // itemsize)

    if chw % 128 == 0:
        # ---------------- main, fully dense path ----------------
        rows, lanes = chw // 128, 128
        x_r = x.reshape(n, rows, lanes)
        out_struct = jax.ShapeDtypeStruct((n, 2, rows, lanes), x.dtype)

        # VMEM elements per sample including sublane padding of the tile.
        per_sample = _round_up(rows, sub) * lanes

        if per_sample <= tgt_elems:
            # Small C*H*W: pack many samples into one block (avoids one
            # ~0.35 us pipeline step per sample when N is large).
            b_blk = max(1, min(n, tgt_elems // per_sample))
            if n % b_blk:  # prefer a batch split with no masked tail block
                d = b_blk
                while d > max(1, b_blk // 2) and n % d:
                    d -= 1
                if n % d == 0:
                    b_blk = d
            r_blk = rows
        else:
            # Large C*H*W: one sample per block, tile the row axis.
            b_blk = 1
            r_cap = max(sub, (tgt_elems // lanes // sub) * sub)
            r_blk = min(rows, r_cap)
            if r_blk < rows:
                r_blk = max(sub, (r_blk // sub) * sub)
                cand = r_blk  # prefer an r_blk dividing rows (no masked tails)
                while cand > max(sub, r_blk // 2) and rows % cand:
                    cand -= sub
                if cand >= sub and rows % cand == 0:
                    r_blk = cand

        g_b, g_r = pl.cdiv(n, b_blk), pl.cdiv(rows, r_blk)
        # Keep >= 2 grid steps so v7x's two TensorCores both get work and the
        # in/out DMAs of consecutive steps overlap (negligible cost on v5e/v6e).
        if g_b * g_r < 2:
            if n >= 2:
                b_blk = -(-n // 2)
                g_b = pl.cdiv(n, b_blk)
            elif rows >= 2 * sub:
                r_blk = _round_up(-(-rows // 2), sub)
                g_r = pl.cdiv(rows, r_blk)

        grid = (g_b, g_r)
        in_spec = pl.BlockSpec((b_blk, r_blk, lanes), lambda i, t: (i, t, 0))
        out_spec = pl.BlockSpec((b_blk, 2, r_blk, lanes), lambda i, t: (i, 0, t, 0))
        kernel = _add_inverse_kernel_4d
    else:
        # ---------------- fallback: C*H*W not a multiple of 128 ----------------
        # Batch on the sublane axis (dense), whole flattened sample on the lane
        # axis -- no size-1 sublane dim, so no 8x VMEM padding / masked input.
        x_r = x.reshape(n, chw)
        out_struct = jax.ShapeDtypeStruct((n, 2, chw), x.dtype)

        lanes_pad = _round_up(chw, 128)
        budget = max(1, vmem_limit // 3)        # bytes per non-buffered step
        per_row = 9 * lanes_pad * itemsize      # 1x in + ~8x out (2->8 sublane pad)

        if per_row <= budget:
            l_blk = chw                          # full lane extent per block
            b_blk = max(1, min(n, budget // per_row))
            if b_blk >= 8:
                b_blk = (b_blk // 8) * 8         # dense input sublanes
            if n >= 2 and b_blk >= n:            # keep >= 2 grid steps
                b_blk = -(-n // 2)
            g_l = 1
        else:
            # A single sample is still too big: tile the lane axis (mult. of 128).
            b_blk = 1
            l_blk = max(128, ((budget // (9 * itemsize)) // 128) * 128)
            g_l = pl.cdiv(chw, l_blk)

        grid = (pl.cdiv(n, b_blk), g_l)
        in_spec = pl.BlockSpec((b_blk, l_blk), lambda i, t: (i, t))
        out_spec = pl.BlockSpec((b_blk, 2, l_blk), lambda i, t: (i, 0, t))
        kernel = _add_inverse_kernel_3d

    out = pl.pallas_call(
        kernel,
        out_shape=out_struct,
        grid_spec=pltpu.PrefetchScalarGridSpec(
            num_scalar_prefetch=0,
            grid=grid,
            in_specs=[in_spec],
            out_specs=out_spec,
        ),
        compiler_params=pltpu.CompilerParams(
            dimension_semantics=("parallel", "parallel"),
            vmem_limit_bytes=vmem_limit,
        ),
        cost_estimate=pl.CostEstimate(
            flops=n * chw,
            transcendentals=0,
            bytes_accessed=3 * n * chw * itemsize,
        ),
    )(x_r)

    # Free (contiguous) reshape back to NCHW with 2C channels.
    return out.reshape(n, 2 * c, h, w)


if __name__ == "__main__":
    key = jax.random.PRNGKey(0)
    x = jax.random.uniform(key, (2, 4, 16, 16), dtype=jnp.float32)

    out = add_inverse(x)
    out = jax.block_until_ready(out)

    # Reference check (plain JAX).
    ref = jnp.concatenate([x, 1.0 - x], axis=1)
    assert out.shape == (2, 8, 16, 16)
    assert out.dtype == x.dtype
    assert jnp.allclose(out, ref, atol=0, rtol=0)

    print("KERNEL_OK")
</pallas_src>

<mosaic_0001>
module attributes {stable_mosaic.version = 11 : i64} {
  func.func @_add_inverse_kernel_4d(%arg0: i32, %arg1: i32, %arg2: memref<1x8x128xf32, #tpu.memory_space<vmem>>, %arg3: memref<1x2x8x128xf32, #tpu.memory_space<vmem>>) attributes {dimension_semantics = [#tpu.dimension_semantics<parallel>, #tpu.dimension_semantics<parallel>], iteration_bounds = array<i64: 2, 1>, scalar_prefetch = 0 : i64, scratch_operands = 0 : i64, tpu.core_type = #tpu.core_type<tc>, window_params = [{transform_indices = @transform_0, window_bounds = array<i64: 1, 8, 128>}, {transform_indices = @transform_1, window_bounds = array<i64: 1, 2, 8, 128>}]} {
    %c0 = arith.constant 0 : index
    %c0_0 = arith.constant 0 : index
    %c0_1 = arith.constant 0 : index
    %0 = vector.load %arg2[%c0, %c0_0, %c0_1] : memref<1x8x128xf32, #tpu.memory_space<vmem>>, vector<1x8x128xf32>
    %c0_2 = arith.constant 0 : index
    %c0_3 = arith.constant 0 : index
    %c0_4 = arith.constant 0 : index
    %c0_5 = arith.constant 0 : index
    %1 = vector.load %arg3[%c0_2, %c0_3, %c0_4, %c0_5] : memref<1x2x8x128xf32, #tpu.memory_space<vmem>>, vector<1x1x8x128xf32>
    %2 = vector.shape_cast %1 : vector<1x1x8x128xf32> to vector<1x8x128xf32>
    %3 = vector.shape_cast %0 : vector<1x8x128xf32> to vector<1x1x8x128xf32>
    tpu.vector_store %arg3[%c0_2, %c0_3, %c0_4, %c0_5], %3 {strides = array<i32>} : memref<1x2x8x128xf32, #tpu.memory_space<vmem>>, vector<1x1x8x128xf32>,
    %cst = arith.constant 1.000000e+00 : f32
    %4 = vector.broadcast %cst : f32 to vector<1x8x128xf32>
    %5 = arith.subf %4, %0 : vector<1x8x128xf32>
    %c0_6 = arith.constant 0 : index
    %c1 = arith.constant 1 : index
    %c0_7 = arith.constant 0 : index
    %c0_8 = arith.constant 0 : index
    %6 = vector.load %arg3[%c0_6, %c1, %c0_7, %c0_8] : memref<1x2x8x128xf32, #tpu.memory_space<vmem>>, vector<1x1x8x128xf32>
    %7 = vector.shape_cast %6 : vector<1x1x8x128xf32> to vector<1x8x128xf32>
    %8 = vector.shape_cast %5 : vector<1x8x128xf32> to vector<1x1x8x128xf32>
    tpu.vector_store %arg3[%c0_6, %c1, %c0_7, %c0_8], %8 {strides = array<i32>} : memref<1x2x8x128xf32, #tpu.memory_space<vmem>>, vector<1x1x8x128xf32>,
    return
  }
  func.func @transform_0(%arg0: i32, %arg1: i32) -> (i32, i32, i32) {
    %c0_i32 = arith.constant 0 : i32
    %c0_i32_0 = arith.constant 0 : i32
    return %arg0, %arg1, %c0_i32 : i32, i32, i32
  }
  func.func @transform_1(%arg0: i32, %arg1: i32) -> (i32, i32, i32, i32) {
    %c0_i32 = arith.constant 0 : i32
    %c0_i32_0 = arith.constant 0 : i32
    %c0_i32_1 = arith.constant 0 : i32
    return %arg0, %c0_i32, %arg1, %c0_i32_0 : i32, i32, i32, i32
  }
}

</mosaic_0001>

<bundles_post_ra>
// kernel: tpu_custom_call.1
= control target key start
LH: loop header
LB: loop body
LE: loop exit
PB: predicated region body
PF: predicated region fallthrough
CT: control target
= control target key end

     0   :  { %6 = vsyncpa [#allocation3], 0  ;;  %s606_s0 = inlined_call_operand.hbm [shape: f32[2,8,128], index: 0, kind: input, shape index: {}]   ;;  %s607_s1 = inlined_call_operand.hbm [shape: f32[2,2,8,128], index: 1, kind: output, shape index: {}]  }
   0x1   :  { %8 = vsyncpa [#allocation3 + $0x1], 0 }
   0x2   :  { %9 = vsyncpa [#allocation4], 0 }
   0x3   :  { %11 = vsyncpa [#allocation4 + $0x1], 0  ;;  %s457_s6 = smov 0   ;;  %s459_s7 = smov 0  }
   0x4   :  { %s461_s8 = smov 0   ;;  %s463_s9 = smov 0  }
   0x5   :  { %s465_s10 = smov 0   ;;  %s467_s11 = smov 0  }
   0x6 LB: > { %s253_s12 = sadd.s32 4294967295, %s441_s11   ;;  %s254_s13 = sadd.s32 4294967294, %s441_s11   ;;  %s441_s11 = sphi %s467_s11, %s17_s11   ;;  %s437_s10 = sphi %s465_s10, %s619_s10   ;;  %s433_s9 = sphi %s463_s9, %s618_s9   ;;  %s429_s8 = sphi %s461_s8, %s617_s8   ;;  %s425_s7 = sphi %s459_s7, %s616_s7   ;;  %s421_s6 = sphi %s457_s6, %s615_s6  }
   0x7   : > { %s29_s14 = sadd.s32 1, %s437_s10  ;;  %s38_s15 = sadd.s32 1, %s429_s8 }
   0x8   : > { %p31_p0 = scmp.ge.s32.totalorder %s29_s14, 2  ;;  %p45_p1 = scmp.ne.s32.totalorder %s429_s8, %s425_s7 }
   0x9   : > { %p46_p2 = scmp.eq.s32.totalorder %s441_s11, 0  ;;  %p51_p3 = scmp.ne.s32.totalorder %s425_s7, %s421_s6 }
   0xa   : > { %s621_s14 = smov (%p31_p0, %s29_s14), 0  ;;  %p52_p5 = scmp.eq.s32.totalorder %s253_s12, 0 }
   0xb   : > { %p498_p4 = por %p46_p2, %p45_p1  ;;  %s33_s17 = ssub.s32 %s437_s10, %s621_s14 }
   0xc   : > { %p77_p6 = scmp.eq.s32.totalorder %s253_s12, 1  ;;  %p36_p7 = scmp.eq.s32.totalorder %s33_s17, 0 }
   0xd   : > { %p504_p8 = por %p52_p5, %p51_p3  ;;  %p83_p10 = scmp.eq.s32.totalorder %s254_s13, 1 }
   0xe   : > { %p508_p9 = por %p77_p6, %p45_p1  ;;  %p281_p13 = scmp.lt.s32.totalorder %s441_s11, 2 }
   0xf   : > { %s513_s20 = scalar_select %p36_p7, %s429_s8, %s38_s15  }
  0x10   : > { %p515_p11 = por %p83_p10, %p51_p3  ;;  %s103_s22 = sand.u32 1, %s429_s8  }
  0x11   : > { %s257_s23 = sshll.u32 %s103_s22, 3  ;;  %s258_s24 = sshll.u32 %s437_s10, 7 }
  0x12   : > { %s611_s21 = scalar_select %p515_p11, 1, 0 }
  0x13   : > { %s113_s27 = scalar_lea.hbm %s606_s0, %s258_s24  ;;  %s107_s28 = scalar_lea.vmem [#allocation2], %s257_s23 }
  0x14   : > { %s115_s29 = sshll.u32 %s107_s28, 4  ;;  %p528_p0 = pnand %p281_p13, %p498_p4  ;;  %s116_s29 = int_to_ptr.vmem [resolvable:$true] %s115_s29 }
  0x15   : > { %p259_p1 = scmp.ge.s32.totalorder %s441_s11, 1  ;;  %p120_p2 = scmp.lt.s32.totalorder %s441_s11, 3 }
  0x16   : > { %s104_s2 = scalar_lea.sflag [#allocation3], %s103_s22  ;;  %p335_p3 = pneg %p528_p0 }
  0x17   : > { %s346_s3 = scalar_lea.vmem %s116_s29, 128  ;;  %s443_s4 = smov [#allocation2]  }
  0x18   : > { %p347_p5 = scmp.ne.s32.totalorder %s116_s29, %s346_s3  ;;  %s351_s5 = sshll.u32 %s443_s4, 4  ;;  %s352_s5 = int_to_ptr.vmem [resolvable:$false] %s351_s5 }
  0x19   : > { %s353_s12 = scalar_lea.vmem %s352_s5, 256  ;;  %p354_p10 = scmp.lt.s32.totalorder %s116_s29, %s352_s5 }
  0x1a   : > { %p349_p6 = pnand %p347_p5, %p335_p3  ;;  %p355_p12 = scmp.lt.s32.totalorder %s353_s12, %s346_s3 }
  0x1c   : > { %p350_p7 = pneg %p349_p6  ;;  %p356_p4 = por %p355_p12, %p354_p10 }
  0x1e   : > { %p357_p13 = pnand %p356_p4, %p350_p7 }
  0x20   : > { %360 = shalt.err (!%p357_p13)
}
  0x21   : > { %276 = dma.hbm_to_vmem [thread:$0]  (!%p528_p0), %s113_s27, 128, %s116_s29, %s104_s2  }
  0x22   : > { %p121_p11 = pnand %p259_p1, %p120_p2 }
  0x23   : > { %s543_s13 = sand.u32 (!%p121_p11), 1, %s425_s7  }
  0x24   : > { %124 = sbr.rel (%p121_p11) target bundleno = 67 (0x43), region = 24  ;;  %s260_s15 = sshll.u32 (!%p121_p11), %s543_s13, 3 }
  0x25   : > { %s127_s16 = scalar_lea.sflag (!%p121_p11), [#allocation3], %s543_s13  ;;  %s130_s17 = scalar_lea.vmem (!%p121_p11), [#allocation2], %s260_s15 }
  0x29   : > { %412 = dma.done.wait (%p504_p8), %s127_s16, 128  }
  0x2a   : > { %414 = vsyncadd (%p504_p8), %s127_s16, 4294967168  ;;  %s261_s22 = sshll.u32 %s543_s13, 4  ;;  %s268_s25 = sshll.u32 %s433_s9, 8  ;;  %v149_v0 = vld [vmem:[%s130_s17] sm:$0xff] }
  0x2b   : > { %s148_s23 = scalar_lea.vmem [#allocation5], %s261_s22  ;;  %s558_s28 = scalar_lea.hbm %s607_s1, %s268_s25  ;;  %v151_v1 = vsub.f32 1.0, %v149_v0 }
  0x2c   : > { %s169_s24 = sshll.u32 %s148_s23, 4  ;;  %150 = vst [vmem:[%s148_s23] sm:$0xff] %v149_v0  ;;  %s155_s18 = scalar_lea.sflag [#allocation4], %s543_s13  ;;  %s553_s24 = int_to_ptr.vmem [resolvable:$true] %s169_s24 }
  0x2d   : > { %262 = vst [vmem:[%s148_s23 + $0x8] sm:$0xff] %v151_v1  ;;  %s361_s29 = scalar_lea.vmem %s553_s24, 256  ;;  %s444_s9 = smov [#allocation5]  }
  0x2e   : > { %p362_p8 = scmp.ne.s32.totalorder %s553_s24, %s361_s29  ;;  %s365_s30 = sshll.u32 %s444_s9, 4  ;;  %s366_s30 = int_to_ptr.vmem [resolvable:$false] %s365_s30 }
  0x2f   : > { %s367_s2 = scalar_lea.vmem %s366_s30, 512  ;;  %p368_p0 = scmp.lt.s32.totalorder %s553_s24, %s366_s30 }
  0x30   : > { %p363_p11 = pnand %p362_p8, %p508_p9  ;;  %p369_p1 = scmp.lt.s32.totalorder %s367_s2, %s361_s29 }
  0x32   : > { %p364_p12 = pneg %p363_p11  ;;  %p370_p2 = por %p369_p1, %p368_p0 }
  0x34   : > { %p371_p3 = pnand %p370_p2, %p364_p12 }
  0x36   : > { %374 = shalt.err (!%p371_p3)
}
  0x37   : > { %s375_s3 = scalar_lea.hbm %s558_s28, 256  ;;  %s379_s12 = scalar_lea.hbm %s607_s1, 512 }
  0x38   : > { %p376_p5 = scmp.ne.s32.totalorder %s558_s28, %s375_s3  ;;  %p380_p10 = scmp.lt.s32.totalorder %s558_s28, %s607_s1 }
  0x39   : > { %p381_p4 = scmp.lt.s32.totalorder %s379_s12, %s375_s3 }
  0x3a   : > { %p377_p6 = pnand %p376_p5, %p508_p9 }
  0x3b   : > { %p382_p13 = por %p381_p4, %p380_p10 }
  0x3c   : > { %p378_p7 = pneg %p377_p6 }
  0x3e   : > { %p383_p8 = pnand %p382_p13, %p378_p7 }
  0x40   : > { %386 = shalt.err (!%p383_p8)
}
  0x41   : > { %s445_s17 = smov 128   ;;  %s446_s22 = smov 8  }
  0x42   : > { %271 = dma.vmem_to_hbm [thread:$0]  (%p508_p9), %s553_s24, 256, %s558_s28, %s155_s18, %s445_s17, %s445_s17, %s446_s22  }
  0x43 PF: > { %s184_s23 = sand.u32 1, %s421_s6   ;;  %p613_p11 = scmp.ne.s32.totalorder %s611_s21, 0 }
  0x44   : > { %p614_p12 = scmp.ge.s32.totalorder %s441_s11, 2  ;;  %s185_s25 = scalar_lea.sflag [#allocation4], %s184_s23 }
  0x46   : > { %p278_p0 = pnand %p614_p12, %p613_p11 }
  0x48   : > { %p279_p1 = pneg %p278_p0 }
  0x4a   : > { %416 = dma.done.wait (%p279_p1), %s185_s25, 256  }
  0x4b   : > { %418 = vsyncadd (%p279_p1), %s185_s25, 4294967040  ;;  %s17_s11 = sadd.s32 1, %s441_s11   ;;  %s615_s6 = smov %s425_s7 }
  0x4c   : > { %p14_p2 = scmp.ge.s32.totalorder %s17_s11, 4   ;;  %s616_s7 = smov %s429_s8 }
  0x4d   : > { %s617_s8 = smov %s513_s20  ;;  %s618_s9 = smov %s437_s10 }
  0x4e   : > { %s619_s10 = smov %s621_s14  ;;  %16 = sbr.rel (!%p14_p2) target bundleno = 6 (0x6), region = 70 }
  0x53   :  { %190 = vsyncpa [#allocation3], 1 }
  0x54   :  { %192 = vsyncpa [#allocation3 + $0x1], 1 }
  0x55   :  { %193 = vsyncpa [#allocation4], 1 }
  0x56   :  { %195 = vsyncpa [#allocation4 + $0x1], 1 }

</bundles_post_ra>
